<compile_context>
chip_gen: v7x
topology: tpu7x:2x2x1
jax: 0.10.0
libtpu: 0.0.40
codegen_flags: <defaults>
</compile_context>

<pallas_src>
import jax
import jax.numpy as jnp
from jax.experimental import pallas as pl
from jax.experimental.pallas import tpu as pltpu

_LANES = 128
_ROW_UNIT = 16               # multiple of the f32 (8) and bf16 (16) sublane tiles
_MAX_TILE_R = 4096           # 4096 x 128 x 4B = 2 MiB/buffer; <=~8 MiB live with
                             # double buffering -> fits v5e's 16 MiB scoped default
_FAST_PATH_BYTES = 256 << 10  # below this output size, fused pure-JAX wins


def _dissq_kernel(x_ref, o_ref):
    # o = 1 - x[:, 0]^2.  The literal 1.0 is weakly typed, so the result stays
    # in the input dtype (matches the PyTorch semantics for f32 / bf16).
    v = x_ref[:, 0:1]
    o_ref[...] = 1.0 - v * v


def _round_up(n: int, m: int) -> int:
    return ((n + m - 1) // m) * m


def dissq(x: jax.Array, *, force_pallas: bool = False) -> jax.Array:
    """Pallas equivalent of Dissq.forward: 1.0 - x[..., 0:1] ** 2.0"""
    orig_shape = x.shape
    out_shape = orig_shape[:-1] + (1,)
    c = orig_shape[-1]

    rows = 1
    for d in orig_shape[:-1]:
        rows *= d

    small = rows * x.dtype.itemsize < _FAST_PATH_BYTES
    if (small and not force_pallas) or rows == 0 or c == 0:
        # Fast path: one fused XLA elementwise kernel, minimal HBM traffic,
        # no kernel-launch / reshape plumbing overhead.
        x0 = x[..., 0:1]
        return 1.0 - x0 * x0

    # Free (layout-preserving) collapse of the leading dims.
    x2d = x.reshape(rows, c)

    # Only DMA the first min(C, 128) columns of each row block into VMEM.
    # (block last dim must be a multiple of 128 or equal the full dim.)
    block_c = c if c <= _LANES else _LANES

    # Row tile: large for big inputs; for medium inputs keep >= 2 grid steps so
    # the "parallel" axis can be sharded across v7x's two TensorCores.
    if rows <= 2 * _ROW_UNIT:
        tile_r = rows                       # single block == full array dims
    else:
        tile_r = min(_MAX_TILE_R, _round_up((rows + 1) // 2, _ROW_UNIT))

    grid = (pl.cdiv(rows, tile_r),)         # partial last block -> masked writes

    out2d = pl.pallas_call(
        _dissq_kernel,
        out_shape=jax.ShapeDtypeStruct((rows, 1), x.dtype),
        grid=grid,
        in_specs=[pl.BlockSpec((tile_r, block_c), lambda i: (i, 0))],
        out_specs=pl.BlockSpec((tile_r, 1), lambda i: (i, 0)),
        compiler_params=pltpu.CompilerParams(
            dimension_semantics=("parallel",)
        ),
    )(x2d)

    return out2d.reshape(out_shape)


if __name__ == "__main__":
    # Small NCHW-style input consistent with the module.
    x = jax.random.normal(jax.random.PRNGKey(0), (2, 4, 16, 16),
                          dtype=jnp.float32)
    ref = 1.0 - x[..., 0:1] ** 2.0

    # Default path for a small input (pure-JAX fast path).
    out_fast = jax.block_until_ready(dissq(x))
    assert out_fast.shape == ref.shape == (2, 4, 16, 1)
    assert out_fast.dtype == ref.dtype
    assert jnp.allclose(out_fast, ref, atol=1e-6, rtol=1e-6)

    # Force the Pallas kernel on the same small input (2-step grid).
    out_pl = jax.block_until_ready(dissq(x, force_pallas=True))
    assert out_pl.shape == ref.shape
    assert out_pl.dtype == ref.dtype
    assert jnp.allclose(out_pl, ref, atol=1e-6, rtol=1e-6)

    # Odd shape + bf16, forced through the Pallas path (partial last block).
    x2 = jax.random.normal(jax.random.PRNGKey(1), (3, 5, 7, 9),
                           dtype=jnp.bfloat16)
    out2 = jax.block_until_ready(dissq(x2, force_pallas=True))
    ref2 = 1.0 - x2[..., 0:1] * x2[..., 0:1]
    assert out2.shape == ref2.shape == (3, 5, 7, 1)
    assert out2.dtype == ref2.dtype
    assert jnp.allclose(out2.astype(jnp.float32), ref2.astype(jnp.float32),
                        atol=1e-2, rtol=1e-2)

    # Rows above the fast-path threshold -> default Pallas path, multi-step
    # grid (17 steps) with a ragged final block.
    x3 = jax.random.normal(jax.random.PRNGKey(2), (6, 70, 160, 5),
                           dtype=jnp.float32)
    out3 = jax.block_until_ready(dissq(x3))
    ref3 = 1.0 - x3[..., 0:1] ** 2.0
    assert out3.shape == ref3.shape == (6, 70, 160, 1)
    assert out3.dtype == ref3.dtype
    assert jnp.allclose(out3, ref3, atol=1e-6, rtol=1e-6)

    print("KERNEL_OK")
</pallas_src>

<mosaic_0001>
module attributes {stable_mosaic.version = 11 : i64} {
  func.func @_dissq_kernel(%arg0: i32, %arg1: memref<64x16xf32, #tpu.memory_space<vmem>>, %arg2: memref<64x1xf32, #tpu.memory_space<vmem>>) attributes {dimension_semantics = [#tpu.dimension_semantics<parallel>], iteration_bounds = array<i64: 2>, scalar_prefetch = 0 : i64, scratch_operands = 0 : i64, tpu.core_type = #tpu.core_type<tc>, window_params = [{transform_indices = @transform_0, window_bounds = array<i64: 64, 16>}, {transform_indices = @transform_1, window_bounds = array<i64: 64, 1>}]} {
    %c0 = arith.constant 0 : index
    %c0_0 = arith.constant 0 : index
    %0 = vector.load %arg1[%c0, %c0_0] : memref<64x16xf32, #tpu.memory_space<vmem>>, vector<64x1xf32>
    %1 = arith.mulf %0, %0 : vector<64x1xf32>
    %cst = arith.constant 1.000000e+00 : f32
    %2 = vector.broadcast %cst : f32 to vector<64x1xf32>
    %3 = arith.subf %2, %1 : vector<64x1xf32>
    %c0_1 = arith.constant 0 : index
    %c0_2 = arith.constant 0 : index
    %4 = vector.load %arg2[%c0_1, %c0_2] : memref<64x1xf32, #tpu.memory_space<vmem>>, vector<64x1xf32>
    tpu.vector_store %arg2[%c0_1, %c0_2], %3 {strides = array<i32>} : memref<64x1xf32, #tpu.memory_space<vmem>>, vector<64x1xf32>,
    return
  }
  func.func @transform_0(%arg0: i32) -> (i32, i32) {
    %c0_i32 = arith.constant 0 : i32
    %c0_i32_0 = arith.constant 0 : i32
    return %arg0, %c0_i32 : i32, i32
  }
  func.func @transform_1(%arg0: i32) -> (i32, i32) {
    %c0_i32 = arith.constant 0 : i32
    %c0_i32_0 = arith.constant 0 : i32
    return %arg0, %c0_i32 : i32, i32
  }
}

</mosaic_0001>

<bundles_post_ra>
// kernel: tpu_custom_call.1
= control target key start
LH: loop header
LB: loop body
LE: loop exit
PB: predicated region body
PF: predicated region fallthrough
CT: control target
= control target key end

     0   :  { %s246_s6 = smov 0   ;;  %s271_s0 = inlined_call_operand.vmem [shape: f32[128,16], index: 0, kind: input, shape index: {}]   ;;  %s272_s1 = inlined_call_operand.vmem [shape: f32[128,1], index: 1, kind: output, shape index: {}]  }
   0x1 LB: > { %s209_s7 = sadd.s32 4294967295, %s234_s6   ;;  %p213_p0 = scmp.ge.s32.totalorder %s234_s6, 1  ;;  %s234_s6 = sphi %s246_s6, %s11_s6  }
   0x2   : > { %p88_p1 = scmp.lt.s32.totalorder %s234_s6, 3 }
   0x4   : > { %p89_p2 = pnand %p213_p0, %p88_p1 }
   0x5   : > { %s214_s8 = sshll.u32 (!%p89_p2), %s209_s7, 3  ;;  %vm144_vm0 = vcmask (!%p89_p2), 7168  }
   0x6   : > { %92 = sbr.rel (%p89_p2) target bundleno = 25 (0x19), region = 24  ;;  %p109_p3 = scmp.lt.s32.totalorder (!%p89_p2), %s214_s8, 15 }
   0xd   : > { %s274_s8 = smov (!%p109_p3, %s214_s8), 15 }
   0xe   : > { %s215_s9 = sshll.u32 %s274_s8, 3 }
   0xf   : > { %s112_s12 = scalar_lea.vmem %s271_s0, %s215_s9  ;;  %s118_s15 = scalar_lea.vmem %s272_s1, %s215_s9 }
  0x10   : > { %v120_v0 = vld [vmem:[%s112_s12] sm:$0xff]  ;;  %v121_v1 = vld [vmem:[%s112_s12 + $0x8] sm:$0xff]  ;;  %v122_v2 = vld [vmem:[%s112_s12 + $0x10] sm:$0xff] }
  0x11   : > { %v128_v3 = vmul.f32 %v120_v0, %v120_v0  ;;  %v129_v4 = vmul.f32 %v121_v1, %v121_v1  ;;  %v130_v5 = vmul.f32 %v122_v2, %v122_v2  ;;  %v123_v6 = vld [vmem:[%s112_s12 + $0x18] sm:$0xff]  ;;  %v124_v7 = vld [vmem:[%s112_s12 + $0x20] sm:$0xff]  ;;  %v125_v8 = vld [vmem:[%s112_s12 + $0x28] sm:$0xff] }
  0x12   : > { %v131_v9 = vmul.f32 %v123_v6, %v123_v6  ;;  %v132_v10 = vmul.f32 %v124_v7, %v124_v7  ;;  %v133_v11 = vmul.f32 %v125_v8, %v125_v8  ;;  %v126_v12 = vld [vmem:[%s112_s12 + $0x30] sm:$0xff]  ;;  %v127_v13 = vld [vmem:[%s112_s12 + $0x38] sm:$0xff] }
  0x13   : > { %v136_v14 = vsub.f32 1.0, %v128_v3  ;;  %v137_v15 = vsub.f32 1.0, %v129_v4  ;;  %v138_v16 = vsub.f32 1.0, %v130_v5  ;;  %v134_v17 = vmul.f32 %v126_v12, %v126_v12 }
  0x14   : > { %v139_v18 = vsub.f32 1.0, %v131_v9  ;;  %v140_v19 = vsub.f32 1.0, %v132_v10  ;;  %v141_v20 = vsub.f32 1.0, %v133_v11  ;;  %v135_v21 = vmul.f32 %v127_v13, %v127_v13 }
  0x15   : > { %145 = vst.msk [vmem:[%s118_s15] sm:$0xff] %vm144_vm0, %v136_v14  ;;  %146 = vst.msk [vmem:[%s118_s15 + $0x8] sm:$0xff] %vm144_vm0, %v137_v15  ;;  %v142_v22 = vsub.f32 1.0, %v134_v17 }
  0x16   : > { %147 = vst.msk [vmem:[%s118_s15 + $0x10] sm:$0xff] %vm144_vm0, %v138_v16  ;;  %148 = vst.msk [vmem:[%s118_s15 + $0x18] sm:$0xff] %vm144_vm0, %v139_v18  ;;  %v143_v23 = vsub.f32 1.0, %v135_v21 }
  0x17   : > { %149 = vst.msk [vmem:[%s118_s15 + $0x20] sm:$0xff] %vm144_vm0, %v140_v19  ;;  %150 = vst.msk [vmem:[%s118_s15 + $0x28] sm:$0xff] %vm144_vm0, %v141_v20 }
  0x18   : > { %151 = vst.msk [vmem:[%s118_s15 + $0x30] sm:$0xff] %vm144_vm0, %v142_v22  ;;  %152 = vst.msk [vmem:[%s118_s15 + $0x38] sm:$0xff] %vm144_vm0, %v143_v23 }
  0x19 PF: > { %s11_s6 = sadd.s32 1, %s234_s6  }
  0x1a   : > { %p8_p4 = scmp.ge.s32.totalorder %s11_s6, 4  }
  0x1c   :  { %10 = sbr.rel (!%p8_p4) target bundleno = 1 (0x1), region = 54 }

</bundles_post_ra>
